<compile_context>
chip_gen: v7x
topology: tpu7x:2x2x1
jax: 0.10.0
libtpu: 0.0.40
codegen_flags: <defaults>
</compile_context>

<pallas_src>
import functools

import jax
import jax.numpy as jnp
from jax.experimental import pallas as pl
from jax.experimental.pallas import tpu as pltpu


# ----------------------------- helpers ------------------------------------ #

def _round_up(x, m):
    return (x + m - 1) // m * m


def _pad_to(a, shape):
    pads = [(0, t - s) for s, t in zip(a.shape, shape)]
    if all(p == (0, 0) for p in pads):
        return a
    return jnp.pad(a, pads)


# ------------------------ Pallas kernel 1: conv matmul --------------------- #
# o = x @ w, K-tiled with an f32 VMEM accumulator; bf16 MXU inputs, bf16 out.

def _matmul_kernel(x_ref, w_ref, o_ref, acc_ref):
    @pl.when(pl.program_id(2) == 0)
    def _():
        acc_ref[...] = jnp.zeros_like(acc_ref)

    acc_ref[...] += jnp.dot(x_ref[...], w_ref[...],
                            preferred_element_type=jnp.float32)

    @pl.when(pl.program_id(2) == pl.num_programs(2) - 1)
    def _():
        o_ref[...] = acc_ref[...].astype(o_ref.dtype)


def _pick_tm(m):
    """Pick tm from {512,256,128} minimizing Mp-M padding waste."""
    cands = [c for c in (512, 256, 128) if c <= _round_up(m, 16)]
    if not cands:
        return _round_up(m, 16)
    return min(cands, key=lambda c: (_round_up(m, c) - m, -c))


def pallas_matmul(x, w, *, compute_dtype=jnp.bfloat16, out_dtype=jnp.bfloat16):
    """x: (M, K), w: (K, N) -> (Mp, Np) out_dtype (padded; pad rows/cols zero)."""
    M, K = x.shape
    K2, N = w.shape
    assert K == K2, (K, K2)

    tm = _pick_tm(M)
    tk = min(512, _round_up(K, 128))
    tn = min(512, _round_up(N, 128))
    Mp, Kp, Np = _round_up(M, tm), _round_up(K, tk), _round_up(N, tn)

    xp = _pad_to(x, (Mp, Kp)).astype(compute_dtype)
    wp = _pad_to(w, (Kp, Np)).astype(compute_dtype)

    grid = (Mp // tm, Np // tn, Kp // tk)
    out = pl.pallas_call(
        _matmul_kernel,
        out_shape=jax.ShapeDtypeStruct((Mp, Np), out_dtype),
        grid_spec=pltpu.PrefetchScalarGridSpec(
            num_scalar_prefetch=0,
            grid=grid,
            in_specs=[
                pl.BlockSpec((tm, tk), lambda i, j, k: (i, k)),
                pl.BlockSpec((tk, tn), lambda i, j, k: (k, j)),
            ],
            out_specs=pl.BlockSpec((tm, tn), lambda i, j, k: (i, j)),
            scratch_shapes=[pltpu.VMEM((tm, tn), jnp.float32)],
        ),
        compiler_params=pltpu.CompilerParams(
            dimension_semantics=("parallel", "parallel", "arbitrary"),
            vmem_limit_bytes=48 * 1024 * 1024,   # safe on v7x (64 MiB physical)
        ),
        cost_estimate=pl.CostEstimate(
            flops=2 * Mp * Np * Kp,
            transcendentals=0,
            bytes_accessed=2 * (Mp * Kp + Kp * Np + Mp * Np),
        ),
    )(xp, wp)
    return out  # padded; caller slices rows, keeps padded (zero) channels


# ---------------- Pallas kernels 2+3: InstanceNorm2d + ReLU ---------------- #
# y: (B, Pp, Cp) bf16 with Pp = padded Ho*Wo (zero pad rows), Cp padded chans.
# Pass 1: per-(b, c) sum / sum-of-squares accumulated over spatial tiles.
# Pass 2: normalize with biased variance (matches InstanceNorm2d) + ReLU.

def _in_stats_kernel(y_ref, sum_ref, sq_ref):
    @pl.when(pl.program_id(2) == 0)
    def _():
        sum_ref[...] = jnp.zeros_like(sum_ref)
        sq_ref[...] = jnp.zeros_like(sq_ref)

    y = y_ref[0].astype(jnp.float32)                 # (tp, tc)
    sum_ref[0] += jnp.sum(y, axis=0, keepdims=True)  # (1, tc)
    sq_ref[0] += jnp.sum(y * y, axis=0, keepdims=True)


def _in_norm_relu_kernel(y_ref, sum_ref, sq_ref, o_ref, *, inv_p, eps):
    y = y_ref[0].astype(jnp.float32)                 # (tp, tc)
    mean = sum_ref[0] * inv_p                        # (1, tc)
    var = jnp.maximum(sq_ref[0] * inv_p - mean * mean, 0.0)   # biased variance
    inv_std = jax.lax.rsqrt(var + eps)
    o_ref[0] = jnp.maximum((y - mean) * inv_std, 0.0).astype(o_ref.dtype)


def pallas_instance_norm_relu(y, n_valid_rows, *, eps=1e-5,
                              out_dtype=jnp.float32):
    """y: (B, Pp, Cp); rows beyond n_valid_rows must be zero (they contribute
    nothing to sum/sumsq; stats are divided by the true pixel count)."""
    B, Pp, Cp = y.shape
    tc = 256 if Cp % 256 == 0 else 128
    tp = min(512, Pp)
    assert Cp % tc == 0 and Pp % tp == 0, (Cp, tc, Pp, tp)
    grid = (B, Cp // tc, Pp // tp)

    sums, sqs = pl.pallas_call(
        _in_stats_kernel,
        out_shape=(jax.ShapeDtypeStruct((B, 1, Cp), jnp.float32),
                   jax.ShapeDtypeStruct((B, 1, Cp), jnp.float32)),
        grid_spec=pltpu.PrefetchScalarGridSpec(
            num_scalar_prefetch=0,
            grid=grid,
            in_specs=[pl.BlockSpec((1, tp, tc), lambda b, c, p: (b, p, c))],
            out_specs=(pl.BlockSpec((1, 1, tc), lambda b, c, p: (b, 0, c)),
                       pl.BlockSpec((1, 1, tc), lambda b, c, p: (b, 0, c))),
        ),
        compiler_params=pltpu.CompilerParams(
            dimension_semantics=("parallel", "parallel", "arbitrary")),
    )(y)

    kernel = functools.partial(_in_norm_relu_kernel,
                               inv_p=1.0 / float(n_valid_rows), eps=eps)
    out = pl.pallas_call(
        kernel,
        out_shape=jax.ShapeDtypeStruct((B, Pp, Cp), out_dtype),
        grid_spec=pltpu.PrefetchScalarGridSpec(
            num_scalar_prefetch=0,
            grid=grid,
            in_specs=[pl.BlockSpec((1, tp, tc), lambda b, c, p: (b, p, c)),
                      pl.BlockSpec((1, 1, tc), lambda b, c, p: (b, 0, c)),
                      pl.BlockSpec((1, 1, tc), lambda b, c, p: (b, 0, c))],
            out_specs=pl.BlockSpec((1, tp, tc), lambda b, c, p: (b, p, c)),
        ),
        compiler_params=pltpu.CompilerParams(
            dimension_semantics=("parallel", "parallel", "parallel")),
    )(y, sums, sqs)
    return out


# ------------------------------ JAX glue ----------------------------------- #

def _im2col(x_pad, kh, kw, stride):
    """x_pad: (B, Hp, Wp, C) NHWC, already reflection-padded (any dtype).

    Returns (B*Ho*Wo, kh*kw*C) with feature order (ky, kx, c) -- tap-major --
    so no transpose of the large activation tensor is needed; the (tiny)
    weight is transposed to match instead.
    """
    B, Hp, Wp, C = x_pad.shape
    Ho = (Hp - kh) // stride + 1
    Wo = (Wp - kw) // stride + 1
    cols = []
    for ky in range(kh):
        for kx in range(kw):
            sl = jax.lax.slice(
                x_pad,
                (0, ky, kx, 0),
                (B, ky + stride * (Ho - 1) + 1, kx + stride * (Wo - 1) + 1, C),
                (1, stride, stride, 1))            # (B, Ho, Wo, C)
            cols.append(sl)
    patches = jnp.concatenate(cols, axis=3)        # (B, Ho, Wo, kh*kw*C)
    return patches.reshape(B * Ho * Wo, kh * kw * C), Ho, Wo


def relu_ins_conv2d_forward(x_nchw, weight, *, stride, padding, eps=1e-5):
    """ReflectionPad2d(padding) -> Conv2d(k, stride, bias) -> InstanceNorm2d
    (affine=False) -> ReLU.

    The conv bias is intentionally omitted: InstanceNorm2d(affine=False)
    subtracts the per-(sample, channel) mean, so a per-channel constant is
    cancelled exactly and the output is identical.
    x_nchw: (B, Cin, H, W) f32; weight: (Cout, Cin, kh, kw) f32.
    Returns (B, Cout, Ho, Wo) f32.
    """
    B, Cin, H, W = x_nchw.shape
    Cout, Cin2, kh, kw = weight.shape
    assert Cin == Cin2

    x = jnp.transpose(x_nchw, (0, 2, 3, 1)).astype(jnp.bfloat16)   # NHWC bf16
    if padding > 0:
        x = jnp.pad(x, ((0, 0), (padding, padding), (padding, padding), (0, 0)),
                    mode="reflect")
    cols, Ho, Wo = _im2col(x, kh, kw, stride)      # (M, kh*kw*Cin) bf16
    # Weight -> (ky, kx, cin, cout), flattened K matches cols' (ky, kx, c).
    w2d = jnp.transpose(weight, (2, 3, 1, 0)).reshape(kh * kw * Cin, Cout)

    y = pallas_matmul(cols, w2d)                   # (Mp, Np) bf16, conv result
    M = B * Ho * Wo
    P = Ho * Wo
    Np = y.shape[1]
    y = y[:M].reshape(B, P, Np)                    # padded channels are zero

    tp = min(512, _round_up(P, 16))
    Pp = _round_up(P, tp)
    if Pp != P:
        y = jnp.pad(y, ((0, 0), (0, Pp - P), (0, 0)))   # zero rows: stats-safe

    y = pallas_instance_norm_relu(y, P, eps=eps)   # (B, Pp, Np) f32
    y = y[:, :P, :Cout].reshape(B, Ho, Wo, Cout)
    return jnp.transpose(y, (0, 3, 1, 2))          # back to NCHW


# ------------------------- pure-JAX reference ------------------------------ #
# Keeps the conv bias to verify that dropping it under InstanceNorm is exact.

def _reference(x_nchw, weight, bias, *, stride, padding, eps=1e-5):
    xp = jnp.pad(x_nchw, ((0, 0), (0, 0), (padding, padding), (padding, padding)),
                 mode="reflect")
    y = jax.lax.conv_general_dilated(
        xp, weight, window_strides=(stride, stride), padding="VALID",
        dimension_numbers=("NCHW", "OIHW", "NCHW"),
        precision=jax.lax.Precision.HIGHEST)
    y = y + bias.reshape(1, -1, 1, 1)
    mean = jnp.mean(y, axis=(2, 3), keepdims=True)
    var = jnp.mean((y - mean) ** 2, axis=(2, 3), keepdims=True)
    return jnp.maximum((y - mean) * jax.lax.rsqrt(var + eps), 0.0)


# -------------------------------- main ------------------------------------- #

if __name__ == "__main__":
    key = jax.random.PRNGKey(0)
    # ReLUINSConv2d(n_in=4, n_out=32, kernel_size=3, stride=2, padding=1)
    B, Cin, H, W = 2, 4, 16, 16
    Cout, ksize, stride, padding = 32, 3, 2, 1

    kx, kw_, kb = jax.random.split(key, 3)
    x = jax.random.normal(kx, (B, Cin, H, W), jnp.float32)
    # gaussian_weights_init: conv weight ~ N(0, 0.02); bias small normal.
    weight = 0.02 * jax.random.normal(kw_, (Cout, Cin, ksize, ksize), jnp.float32)
    bias = 0.01 * jax.random.normal(kb, (Cout,), jnp.float32)

    fwd = jax.jit(functools.partial(relu_ins_conv2d_forward,
                                    stride=stride, padding=padding))
    out = jax.block_until_ready(fwd(x, weight))

    Ho = (H + 2 * padding - ksize) // stride + 1
    Wo = (W + 2 * padding - ksize) // stride + 1
    assert out.shape == (B, Cout, Ho, Wo), out.shape

    ref = _reference(x, weight, bias, stride=stride, padding=padding)
    max_err = float(jnp.max(jnp.abs(out - ref)))
    # bf16 MXU inputs + bf16 intermediate, f32 accumulation, O(1) normalized
    # outputs -> small absolute error.
    assert max_err < 0.1, f"max abs error {max_err}"

    print("KERNEL_OK")
</pallas_src>

<mosaic_0001>
module attributes {stable_mosaic.version = 11 : i64} {
  func.func @_in_stats_kernel(%arg0: i32, %arg1: i32, %arg2: i32, %arg3: memref<1x64x128xbf16, #tpu.memory_space<vmem>>, %arg4: memref<1x1x128xf32, #tpu.memory_space<vmem>>, %arg5: memref<1x1x128xf32, #tpu.memory_space<vmem>>) attributes {dimension_semantics = [#tpu.dimension_semantics<parallel>, #tpu.dimension_semantics<parallel>, #tpu.dimension_semantics<arbitrary>], iteration_bounds = array<i64: 2, 1, 1>, scalar_prefetch = 0 : i64, scratch_operands = 0 : i64, tpu.core_type = #tpu.core_type<tc>, window_params = [{transform_indices = @transform_0, window_bounds = array<i64: 1, 64, 128>}, {transform_indices = @transform_1, window_bounds = array<i64: 1, 1, 128>}, {transform_indices = @transform_2, window_bounds = array<i64: 1, 1, 128>}]} {
    %c0_i32 = arith.constant 0 : i32
    %0 = arith.cmpi eq, %arg2, %c0_i32 : i32
    %1 = arith.extui %0 : i1 to i32
    %c0_i32_0 = arith.constant 0 : i32
    %2 = arith.cmpi ne, %1, %c0_i32_0 : i32
    scf.if %2 {
      %cst_16 = arith.constant 0.000000e+00 : f32
      %23 = vector.broadcast %cst_16 : f32 to vector<1x1x128xf32>
      %c0_17 = arith.constant 0 : index
      %c0_18 = arith.constant 0 : index
      %c0_19 = arith.constant 0 : index
      %24 = vector.load %arg4[%c0_17, %c0_18, %c0_19] : memref<1x1x128xf32, #tpu.memory_space<vmem>>, vector<1x1x128xf32>
      tpu.vector_store %arg4[%c0_17, %c0_18, %c0_19], %23 {strides = array<i32>} : memref<1x1x128xf32, #tpu.memory_space<vmem>>, vector<1x1x128xf32>,
      %cst_20 = arith.constant 0.000000e+00 : f32
      %25 = vector.broadcast %cst_20 : f32 to vector<1x1x128xf32>
      %c0_21 = arith.constant 0 : index
      %c0_22 = arith.constant 0 : index
      %c0_23 = arith.constant 0 : index
      %26 = vector.load %arg5[%c0_21, %c0_22, %c0_23] : memref<1x1x128xf32, #tpu.memory_space<vmem>>, vector<1x1x128xf32>
      tpu.vector_store %arg5[%c0_21, %c0_22, %c0_23], %25 {strides = array<i32>} : memref<1x1x128xf32, #tpu.memory_space<vmem>>, vector<1x1x128xf32>,
    } else {
    }
    %c0 = arith.constant 0 : index
    %c0_1 = arith.constant 0 : index
    %c0_2 = arith.constant 0 : index
    %3 = vector.load %arg3[%c0, %c0_1, %c0_2] : memref<1x64x128xbf16, #tpu.memory_space<vmem>>, vector<1x64x128xbf16>
    %4 = vector.shape_cast %3 : vector<1x64x128xbf16> to vector<64x128xbf16>
    %5 = arith.extf %4 : vector<64x128xbf16> to vector<64x128xf32>
    %c0_3 = arith.constant 0 : index
    %c0_4 = arith.constant 0 : index
    %c0_5 = arith.constant 0 : index
    %6 = vector.load %arg4[%c0_3, %c0_4, %c0_5] : memref<1x1x128xf32, #tpu.memory_space<vmem>>, vector<1x1x128xf32>
    %7 = vector.shape_cast %6 : vector<1x1x128xf32> to vector<1x128xf32>
    %cst = arith.constant dense<0.000000e+00> : vector<128xf32>
    %8 = vector.multi_reduction <add>, %5, %cst [0] : vector<64x128xf32> to vector<128xf32>
    %9 = vector.shape_cast %8 : vector<128xf32> to vector<1x128xf32>
    %10 = arith.addf %7, %9 : vector<1x128xf32>
    %c0_6 = arith.constant 0 : index
    %c0_7 = arith.constant 0 : index
    %c0_8 = arith.constant 0 : index
    %11 = vector.load %arg4[%c0_6, %c0_7, %c0_8] : memref<1x1x128xf32, #tpu.memory_space<vmem>>, vector<1x1x128xf32>
    %12 = vector.shape_cast %11 : vector<1x1x128xf32> to vector<1x128xf32>
    %13 = vector.shape_cast %10 : vector<1x128xf32> to vector<1x1x128xf32>
    tpu.vector_store %arg4[%c0_6, %c0_7, %c0_8], %13 {strides = array<i32>} : memref<1x1x128xf32, #tpu.memory_space<vmem>>, vector<1x1x128xf32>,
    %c0_9 = arith.constant 0 : index
    %c0_10 = arith.constant 0 : index
    %c0_11 = arith.constant 0 : index
    %14 = vector.load %arg5[%c0_9, %c0_10, %c0_11] : memref<1x1x128xf32, #tpu.memory_space<vmem>>, vector<1x1x128xf32>
    %15 = vector.shape_cast %14 : vector<1x1x128xf32> to vector<1x128xf32>
    %16 = arith.mulf %5, %5 : vector<64x128xf32>
    %cst_12 = arith.constant dense<0.000000e+00> : vector<128xf32>
    %17 = vector.multi_reduction <add>, %16, %cst_12 [0] : vector<64x128xf32> to vector<128xf32>
    %18 = vector.shape_cast %17 : vector<128xf32> to vector<1x128xf32>
    %19 = arith.addf %15, %18 : vector<1x128xf32>
    %c0_13 = arith.constant 0 : index
    %c0_14 = arith.constant 0 : index
    %c0_15 = arith.constant 0 : index
    %20 = vector.load %arg5[%c0_13, %c0_14, %c0_15] : memref<1x1x128xf32, #tpu.memory_space<vmem>>, vector<1x1x128xf32>
    %21 = vector.shape_cast %20 : vector<1x1x128xf32> to vector<1x128xf32>
    %22 = vector.shape_cast %19 : vector<1x128xf32> to vector<1x1x128xf32>
    tpu.vector_store %arg5[%c0_13, %c0_14, %c0_15], %22 {strides = array<i32>} : memref<1x1x128xf32, #tpu.memory_space<vmem>>, vector<1x1x128xf32>,
    return
  }
  func.func @transform_0(%arg0: i32, %arg1: i32, %arg2: i32) -> (i32, i32, i32) {
    %c0_i32 = arith.constant 0 : i32
    return %arg0, %arg2, %arg1 : i32, i32, i32
  }
  func.func @transform_1(%arg0: i32, %arg1: i32, %arg2: i32) -> (i32, i32, i32) {
    %c0_i32 = arith.constant 0 : i32
    %c0_i32_0 = arith.constant 0 : i32
    return %arg0, %c0_i32, %arg1 : i32, i32, i32
  }
  func.func @transform_2(%arg0: i32, %arg1: i32, %arg2: i32) -> (i32, i32, i32) {
    %c0_i32 = arith.constant 0 : i32
    %c0_i32_0 = arith.constant 0 : i32
    return %arg0, %c0_i32, %arg1 : i32, i32, i32
  }
}

module attributes {stable_mosaic.version = 11 : i64} {
  func.func @_matmul_kernel(%arg0: i32, %arg1: i32, %arg2: i32, %arg3: memref<128x128xbf16, #tpu.memory_space<vmem>>, %arg4: memref<128x128xbf16, #tpu.memory_space<vmem>>, %arg5: memref<128x128xbf16, #tpu.memory_space<vmem>>, %arg6: memref<128x128xf32, #tpu.memory_space<vmem>>) attributes {dimension_semantics = [#tpu.dimension_semantics<parallel>, #tpu.dimension_semantics<parallel>, #tpu.dimension_semantics<arbitrary>], iteration_bounds = array<i64: 1, 1, 1>, scalar_prefetch = 0 : i64, scratch_operands = 1 : i64, tpu.core_type = #tpu.core_type<tc>, window_params = [{transform_indices = @transform_0, window_bounds = array<i64: 128, 128>}, {transform_indices = @transform_1, window_bounds = array<i64: 128, 128>}, {transform_indices = @transform_2, window_bounds = array<i64: 128, 128>}]} {
    %c0_i32 = arith.constant 0 : i32
    %0 = arith.cmpi eq, %arg2, %c0_i32 : i32
    %1 = arith.extui %0 : i1 to i32
    %c0_i32_0 = arith.constant 0 : i32
    %2 = arith.cmpi ne, %1, %c0_i32_0 : i32
    scf.if %2 {
      %cst_10 = arith.constant 0.000000e+00 : f32
      %12 = vector.broadcast %cst_10 : f32 to vector<128x128xf32>
      %c0_11 = arith.constant 0 : index
      %c0_12 = arith.constant 0 : index
      %13 = vector.load %arg6[%c0_11, %c0_12] : memref<128x128xf32, #tpu.memory_space<vmem>>, vector<128x128xf32>
      tpu.vector_store %arg6[%c0_11, %c0_12], %12 {strides = array<i32>} : memref<128x128xf32, #tpu.memory_space<vmem>>, vector<128x128xf32>,
    } else {
    }
    %c0 = arith.constant 0 : index
    %c0_1 = arith.constant 0 : index
    %3 = vector.load %arg6[%c0, %c0_1] : memref<128x128xf32, #tpu.memory_space<vmem>>, vector<128x128xf32>
    %c0_2 = arith.constant 0 : index
    %c0_3 = arith.constant 0 : index
    %4 = vector.load %arg3[%c0_2, %c0_3] : memref<128x128xbf16, #tpu.memory_space<vmem>>, vector<128x128xbf16>
    %c0_4 = arith.constant 0 : index
    %c0_5 = arith.constant 0 : index
    %5 = vector.load %arg4[%c0_4, %c0_5] : memref<128x128xbf16, #tpu.memory_space<vmem>>, vector<128x128xbf16>
    %cst = arith.constant dense<0.000000e+00> : vector<128x128xf32>
    %6 = tpu.matmul %4, %5, %cst {dimension_numbers = #tpu.dot_dimension_numbers<[1], [0], [0], [1], [0, 0, 1, 1], [], []>} : vector<128x128xbf16>, vector<128x128xbf16>, vector<128x128xf32> -> vector<128x128xf32>
    %7 = arith.addf %3, %6 : vector<128x128xf32>
    %c0_6 = arith.constant 0 : index
    %c0_7 = arith.constant 0 : index
    %8 = vector.load %arg6[%c0_6, %c0_7] : memref<128x128xf32, #tpu.memory_space<vmem>>, vector<128x128xf32>
    tpu.vector_store %arg6[%c0_6, %c0_7], %7 {strides = array<i32>} : memref<128x128xf32, #tpu.memory_space<vmem>>, vector<128x128xf32>,
    %c0_i32_8 = arith.constant 0 : i32
    %9 = arith.cmpi eq, %arg2, %c0_i32_8 : i32
    %10 = arith.extui %9 : i1 to i32
    %c0_i32_9 = arith.constant 0 : i32
    %11 = arith.cmpi ne, %10, %c0_i32_9 : i32
    scf.if %11 {
      %c0_10 = arith.constant 0 : index
      %c0_11 = arith.constant 0 : index
      %12 = vector.load %arg6[%c0_10, %c0_11] : memref<128x128xf32, #tpu.memory_space<vmem>>, vector<128x128xf32>
      %13 = arith.truncf %12 : vector<128x128xf32> to vector<128x128xbf16>
      %c0_12 = arith.constant 0 : index
      %c0_13 = arith.constant 0 : index
      %14 = vector.load %arg5[%c0_12, %c0_13] : memref<128x128xbf16, #tpu.memory_space<vmem>>, vector<128x128xbf16>
      tpu.vector_store %arg5[%c0_12, %c0_13], %13 {strides = array<i32>} : memref<128x128xbf16, #tpu.memory_space<vmem>>, vector<128x128xbf16>,
    } else {
    }
    return
  }
  func.func @transform_0(%arg0: i32, %arg1: i32, %arg2: i32) -> (i32, i32) {
    %c0_i32 = arith.constant 0 : i32
    return %arg0, %arg2 : i32, i32
  }
  func.func @transform_1(%arg0: i32, %arg1: i32, %arg2: i32) -> (i32, i32) {
    %c0_i32 = arith.constant 0 : i32
    return %arg2, %arg1 : i32, i32
  }
  func.func @transform_2(%arg0: i32, %arg1: i32, %arg2: i32) -> (i32, i32) {
    %c0_i32 = arith.constant 0 : i32
    return %arg0, %arg1 : i32, i32
  }
}

module attributes {stable_mosaic.version = 11 : i64} {
  func.func @_in_norm_relu_kernel(%arg0: i32, %arg1: i32, %arg2: i32, %arg3: memref<1x64x128xbf16, #tpu.memory_space<vmem>>, %arg4: memref<1x1x128xf32, #tpu.memory_space<vmem>>, %arg5: memref<1x1x128xf32, #tpu.memory_space<vmem>>, %arg6: memref<1x64x128xf32, #tpu.memory_space<vmem>>) attributes {dimension_semantics = [#tpu.dimension_semantics<parallel>, #tpu.dimension_semantics<parallel>, #tpu.dimension_semantics<parallel>], iteration_bounds = array<i64: 2, 1, 1>, scalar_prefetch = 0 : i64, scratch_operands = 0 : i64, tpu.core_type = #tpu.core_type<tc>, window_params = [{transform_indices = @transform_0, window_bounds = array<i64: 1, 64, 128>}, {transform_indices = @transform_1, window_bounds = array<i64: 1, 1, 128>}, {transform_indices = @transform_2, window_bounds = array<i64: 1, 1, 128>}, {transform_indices = @transform_3, window_bounds = array<i64: 1, 64, 128>}]} {
    %c0 = arith.constant 0 : index
    %c0_0 = arith.constant 0 : index
    %c0_1 = arith.constant 0 : index
    %0 = vector.load %arg3[%c0, %c0_0, %c0_1] : memref<1x64x128xbf16, #tpu.memory_space<vmem>>, vector<1x64x128xbf16>
    %1 = vector.shape_cast %0 : vector<1x64x128xbf16> to vector<64x128xbf16>
    %2 = arith.extf %1 : vector<64x128xbf16> to vector<64x128xf32>
    %c0_2 = arith.constant 0 : index
    %c0_3 = arith.constant 0 : index
    %c0_4 = arith.constant 0 : index
    %3 = vector.load %arg4[%c0_2, %c0_3, %c0_4] : memref<1x1x128xf32, #tpu.memory_space<vmem>>, vector<1x1x128xf32>
    %4 = vector.shape_cast %3 : vector<1x1x128xf32> to vector<1x128xf32>
    %cst = arith.constant 1.562500e-02 : f32
    %5 = vector.broadcast %cst : f32 to vector<1x128xf32>
    %6 = arith.mulf %4, %5 : vector<1x128xf32>
    %c0_5 = arith.constant 0 : index
    %c0_6 = arith.constant 0 : index
    %c0_7 = arith.constant 0 : index
    %7 = vector.load %arg5[%c0_5, %c0_6, %c0_7] : memref<1x1x128xf32, #tpu.memory_space<vmem>>, vector<1x1x128xf32>
    %8 = vector.shape_cast %7 : vector<1x1x128xf32> to vector<1x128xf32>
    %cst_8 = arith.constant 1.562500e-02 : f32
    %9 = vector.broadcast %cst_8 : f32 to vector<1x128xf32>
    %10 = arith.mulf %8, %9 : vector<1x128xf32>
    %11 = arith.mulf %6, %6 : vector<1x128xf32>
    %12 = arith.subf %10, %11 : vector<1x128xf32>
    %cst_9 = arith.constant 0.000000e+00 : f32
    %13 = vector.broadcast %cst_9 : f32 to vector<1x128xf32>
    %14 = arith.maximumf %12, %13 : vector<1x128xf32>
    %cst_10 = arith.constant 9.99999974E-6 : f32
    %15 = vector.broadcast %cst_10 : f32 to vector<1x128xf32>
    %16 = arith.addf %14, %15 : vector<1x128xf32>
    %17 = math.rsqrt %16 : vector<1x128xf32>
    %18 = vector.broadcast %6 : vector<1x128xf32> to vector<64x128xf32>
    %19 = arith.subf %2, %18 : vector<64x128xf32>
    %20 = vector.broadcast %17 : vector<1x128xf32> to vector<64x128xf32>
    %21 = arith.mulf %19, %20 : vector<64x128xf32>
    %cst_11 = arith.constant 0.000000e+00 : f32
    %22 = vector.broadcast %cst_11 : f32 to vector<64x128xf32>
    %23 = arith.maximumf %21, %22 : vector<64x128xf32>
    %c0_12 = arith.constant 0 : index
    %c0_13 = arith.constant 0 : index
    %c0_14 = arith.constant 0 : index
    %24 = vector.load %arg6[%c0_12, %c0_13, %c0_14] : memref<1x64x128xf32, #tpu.memory_space<vmem>>, vector<1x64x128xf32>
    %25 = vector.shape_cast %24 : vector<1x64x128xf32> to vector<64x128xf32>
    %26 = vector.shape_cast %23 : vector<64x128xf32> to vector<1x64x128xf32>
    tpu.vector_store %arg6[%c0_12, %c0_13, %c0_14], %26 {strides = array<i32>} : memref<1x64x128xf32, #tpu.memory_space<vmem>>, vector<1x64x128xf32>,
    return
  }
  func.func @transform_0(%arg0: i32, %arg1: i32, %arg2: i32) -> (i32, i32, i32) {
    %c0_i32 = arith.constant 0 : i32
    return %arg0, %arg2, %arg1 : i32, i32, i32
  }
  func.func @transform_1(%arg0: i32, %arg1: i32, %arg2: i32) -> (i32, i32, i32) {
    %c0_i32 = arith.constant 0 : i32
    %c0_i32_0 = arith.constant 0 : i32
    return %arg0, %c0_i32, %arg1 : i32, i32, i32
  }
  func.func @transform_2(%arg0: i32, %arg1: i32, %arg2: i32) -> (i32, i32, i32) {
    %c0_i32 = arith.constant 0 : i32
    %c0_i32_0 = arith.constant 0 : i32
    return %arg0, %c0_i32, %arg1 : i32, i32, i32
  }
  func.func @transform_3(%arg0: i32, %arg1: i32, %arg2: i32) -> (i32, i32, i32) {
    %c0_i32 = arith.constant 0 : i32
    return %arg0, %arg2, %arg1 : i32, i32, i32
  }
}

</mosaic_0001>

<bundles_post_ra>
// kernel: relu_ins_conv2d_forward.4
= control target key start
LH: loop header
LB: loop body
LE: loop exit
PB: predicated region body
PF: predicated region fallthrough
CT: control target
= control target key end

     0   :  { %s479_s9 = smov 0   ;;  %s481_s10 = smov 0   ;;  %s525_s0 = inlined_call_operand.vmem [shape: bf16[2,64,128], index: 0, kind: input, shape index: {}]   ;;  %s526_s1 = inlined_call_operand.vmem [shape: f32[2,1,128], index: 1, kind: output, shape index: {0}]   ;;  %s527_s2 = inlined_call_operand.vmem [shape: f32[2,1,128], index: 2, kind: output, shape index: {1}]  }
   0x1   :  { %s483_s11 = smov 0  }
   0x2 LB: > { %s32_s12 = sadd.s32 1, %s457_s10  ;;  %p389_p0 = scmp.ge.s32.totalorder %s461_s11, 1  ;;  %s461_s11 = sphi %s483_s11, %s13_s11   ;;  %s457_s10 = sphi %s481_s10, %s529_s10   ;;  %s453_s9 = sphi %s479_s9, %s528_s9  }
   0x3   : > { %p34_p1 = scmp.ge.s32.totalorder %s32_s12, 2  ;;  %p150_p2 = scmp.lt.s32.totalorder %s461_s11, 3 }
   0x5   : > { %s531_s12 = smov (%p34_p1, %s32_s12), 0  ;;  %p151_p3 = pnand %p389_p0, %p150_p2 }
   0x6   : > { %p187_p4 = scmp.lt.s32.totalorder (!%p151_p3), %s453_s9, 1  ;;  %v463_v0 = vmov (!%p151_p3), 0.0  }
   0x7   : > { %154 = sbr.rel (%p151_p3) target bundleno = 51 (0x33), region = 24 }
   0xe   : > { %s533_s9 = smov (!%p187_p4, %s453_s9), 1 }
   0xf   : > { %s394_s13 = sshll.u32 %s533_s9, 5  ;;  %s500_s16 = scalar_lea.vmem %s526_s1, %s533_s9 }
  0x10   : > { %s197_s19 = scalar_lea.vmem %s525_s0, %s394_s13  ;;  %215 = vst [vmem:[%s500_s16] sm:$0x1] %v463_v0  ;;  %s509_s22 = scalar_lea.vmem %s527_s2, %s533_s9 }
  0x11   : > { %v396_v1 = vld [vmem:[%s197_s19] sm:$0xff]   ;;  %v411_v2 = vld [vmem:[%s197_s19 + $0x8] sm:$0xff]   ;;  %v412_v3 = vld [vmem:[%s197_s19 + $0x10] sm:$0xff]   ;;  %216 = vst [vmem:[%s509_s22] sm:$0x1] %v463_v0 }
  0x12   : > { %v397_v4 = vunpack.c.l.bf16 %v396_v1  ;;  %v398_v5 = vunpack.c.h.bf16 %v396_v1  ;;  %v401_v6 = vunpack.c.l.bf16 %v411_v2  ;;  %v402_v7 = vunpack.c.h.bf16 %v411_v2  ;;  %v413_v13 = vld [vmem:[%s197_s19 + $0x18] sm:$0xff]  }
  0x13   : > { %v405_v8 = vunpack.c.l.bf16 %v412_v3  ;;  %v406_v14 = vunpack.c.h.bf16 %v412_v3  ;;  %v409_v18 = vunpack.c.l.bf16 %v413_v13  ;;  %v410_v25 = vunpack.c.h.bf16 %v413_v13 }
  0x14   : > { %v234_v9 = vadd.f32 %v398_v5, %v397_v4  ;;  %v250_v10 = vmul.f32 %v397_v4, %v397_v4  ;;  %v251_v11 = vmul.f32 %v398_v5, %v398_v5  ;;  %v252_v12 = vmul.f32 %v401_v6, %v401_v6 }
  0x15   : > { %v253_v16 = vmul.f32 %v402_v7, %v402_v7  ;;  %v254_v20 = vmul.f32 %v405_v8, %v405_v8  ;;  %v255_v23 = vmul.f32 %v406_v14, %v406_v14  ;;  %v256_v27 = vmul.f32 %v409_v18, %v409_v18 }
  0x16   : > { %v235_v15 = vadd.f32 %v401_v6, %v234_v9  ;;  %v258_v17 = vadd.f32 %v251_v11, %v250_v10  ;;  %v257_v30 = vmul.f32 %v410_v25, %v410_v25 }
  0x17   : > { %v233_v44 = vld [vmem:[%s500_s16] sm:$0x1] }
  0x18   : > { %v236_v19 = vadd.f32 %v402_v7, %v235_v15  ;;  %v259_v21 = vadd.f32 %v258_v17, %v252_v12  ;;  %v249_v47 = vld [vmem:[%s509_s22] sm:$0x1] }
  0x1a   : > { %v237_v22 = vadd.f32 %v405_v8, %v236_v19  ;;  %v260_v24 = vadd.f32 %v259_v21, %v253_v16 }
  0x1c   : > { %v238_v26 = vadd.f32 %v406_v14, %v237_v22  ;;  %v261_v28 = vadd.f32 %v260_v24, %v254_v20 }
  0x1e   : > { %v239_v29 = vadd.f32 %v409_v18, %v238_v26  ;;  %v262_v31 = vadd.f32 %v261_v28, %v255_v23 }
  0x20   : > { %v240_v32 = vadd.f32 %v410_v25, %v239_v29  ;;  %v263_v33 = vadd.f32 %v262_v31, %v256_v27 }
  0x22   : > { %v241_v34 = vrot.slane %v240_v32, 4  ;;  %v264_v35 = vadd.f32 %v263_v33, %v257_v30 }
  0x24   : > { %v242_v36 = vadd.f32 %v241_v34, %v240_v32  ;;  %v265_v37 = vrot.slane %v264_v35, 4 }
  0x26   : > { %v243_v38 = vrot.slane %v242_v36, 2  ;;  %v266_v39 = vadd.f32 %v265_v37, %v264_v35 }
  0x28   : > { %v244_v40 = vadd.f32 %v243_v38, %v242_v36  ;;  %v267_v41 = vrot.slane %v266_v39, 2 }
  0x2a   : > { %v245_v42 = vrot.slane %v244_v40, 1  ;;  %v268_v43 = vadd.f32 %v267_v41, %v266_v39 }
  0x2c   : > { %v246_v45 = vadd.f32 %v245_v42, %v244_v40  ;;  %v269_v46 = vrot.slane %v268_v43, 1 }
  0x2e   : > { %v247_v48 = vadd.f32 %v246_v45, %v233_v44  ;;  %v270_v49 = vadd.f32 %v269_v46, %v268_v43 }
  0x30   : > { %248 = vst [vmem:[%s500_s16] sm:$0x1] %v247_v48  ;;  %v271_v50 = vadd.f32 %v270_v49, %v249_v47 }
  0x32   : > { %272 = vst [vmem:[%s509_s22] sm:$0x1] %v271_v50 }
  0x33 PF: > { %s13_s11 = sadd.s32 1, %s461_s11   ;;  %s528_s9 = smov %s457_s10 }
  0x34   : > { %p10_p5 = scmp.ge.s32.totalorder %s13_s11, 4   ;;  %s529_s10 = smov %s531_s12 }
  0x36   :  { %12 = sbr.rel (!%p10_p5) target bundleno = 2 (0x2), region = 70 }

// kernel: relu_ins_conv2d_forward.5
= control target key start
LH: loop header
LB: loop body
LE: loop exit
PB: predicated region body
PF: predicated region fallthrough
CT: control target
= control target key end

     0   :  { %s584_s12 = smov 0   ;;  %s586_s13 = smov 0   ;;  %s629_s0 = inlined_call_operand.vmem [shape: bf16[2,64,128], index: 0, kind: input, shape index: {}]   ;;  %s630_s1 = inlined_call_operand.vmem [shape: f32[2,1,128], index: 1, kind: input, shape index: {}]   ;;  %s631_s2 = inlined_call_operand.vmem [shape: f32[2,1,128], index: 2, kind: input, shape index: {}]   ;;  %s632_s3 = inlined_call_operand.vmem [shape: f32[2,64,128], index: 3, kind: output, shape index: {}]  }
   0x1   :  { %s588_s14 = smov 0  }
   0x2 LB: > { %s32_s15 = sadd.s32 1, %s558_s13  ;;  %p486_p0 = scmp.ge.s32.totalorder %s562_s14, 1  ;;  %s562_s14 = sphi %s588_s14, %s13_s14   ;;  %s558_s13 = sphi %s586_s13, %s634_s13   ;;  %s554_s12 = sphi %s584_s12, %s633_s12  }
   0x3   : > { %p34_p1 = scmp.ge.s32.totalorder %s32_s15, 2  ;;  %p198_p2 = scmp.lt.s32.totalorder %s562_s14, 3 }
   0x5   : > { %s636_s15 = smov (%p34_p1, %s32_s15), 0  ;;  %p199_p3 = pnand %p486_p0, %p198_p2 }
   0x6   : > { %p249_p4 = scmp.lt.s32.totalorder (!%p199_p3), %s554_s12, 1  ;;  %v312_v5 = vlaneseq (!%p199_p3) }
   0x7   : > { %202 = sbr.rel (%p199_p3) target bundleno = 48 (0x30), region = 32 }
   0x8   : > { %v313_v8 = vshrl.u32 (!%p199_p3), %v312_v5, 7 }
   0xa   : > { %v314_v11 = vsub.s32 (!%p199_p3), 0, %v313_v8 }
   0xe   : > { %s638_s12 = smov (!%p249_p4, %s554_s12), 1 }
   0xf   : > { %s266_s18 = scalar_lea.vmem %s630_s1, %s638_s12  ;;  %s272_s21 = scalar_lea.vmem %s631_s2, %s638_s12 }
  0x10   : > { %v302_v0 = vld [vmem:[%s266_s18] sm:$0x1]  ;;  %s493_s22 = sshll.u32 %s638_s12, 5  ;;  %s494_s26 = sshll.u32 %s638_s12, 6 }
  0x11   : > { %v303_v1 = vmul.f32 0.015625, %v302_v0  ;;  %v304_v2 = vld [vmem:[%s272_s21] sm:$0x1]  ;;  %s259_s25 = scalar_lea.vmem %s629_s0, %s493_s22  ;;  %s284_s29 = scalar_lea.vmem %s632_s3, %s494_s26 }
  0x12   : > { %v305_v3 = vmul.f32 0.015625, %v304_v2  ;;  %v496_v10 = vld [vmem:[%s259_s25] sm:$0xff]   ;;  %v511_v12 = vld [vmem:[%s259_s25 + $0x8] sm:$0xff]   ;;  %v512_v13 = vld [vmem:[%s259_s25 + $0x10] sm:$0xff]  }
  0x13   : > { %v306_v4 = vmul.f32 %v303_v1, %v303_v1  ;;  %v513_v14 = vld [vmem:[%s259_s25 + $0x18] sm:$0xff]   ;;  %v497_v15 = vunpack.c.l.bf16 %v496_v10  ;;  %v315_v16 = vrot.slane %v303_v1, %v314_v11  ;;  %v498_v17 = vunpack.c.h.bf16 %v496_v10 }
  0x14   : > { %v501_v18 = vunpack.c.l.bf16 %v511_v12  ;;  %v502_v19 = vunpack.c.h.bf16 %v511_v12  ;;  %v505_v20 = vunpack.c.l.bf16 %v512_v13  ;;  %v506_v21 = vunpack.c.h.bf16 %v512_v13 }
  0x15   : > { %v307_v6 = vsub.f32 %v305_v3, %v306_v4  ;;  %v509_v22 = vunpack.c.l.bf16 %v513_v14  ;;  %v510_v23 = vunpack.c.h.bf16 %v513_v14  ;;  %v317_v24 = vsub.f32 %v497_v15, %v315_v16 }
  0x16   : > { %v318_v25 = vsub.f32 %v498_v17, %v315_v16  ;;  %v319_v26 = vsub.f32 %v501_v18, %v315_v16  ;;  %v320_v27 = vsub.f32 %v502_v19, %v315_v16  ;;  %v321_v29 = vsub.f32 %v505_v20, %v315_v16 }
  0x17   : > { %v308_v7 = vmax.f32 %v307_v6, 0.0  ;;  %v322_v30 = vsub.f32 %v506_v21, %v315_v16  ;;  %v323_v31 = vsub.f32 %v509_v22, %v315_v16  ;;  %v324_v32 = vsub.f32 %v510_v23, %v315_v16 }
  0x19   : > { %v309_v9 = vadd.f32 1e-05, %v308_v7 }
  0x1b   : > { %538 = vrsqrt.f32 %v309_v9 }
  0x25   : > { %v539_v28 = vpop.eup %538 }
  0x26   : > { %v329_v33 = vrot.slane %v539_v28, %v314_v11 }
  0x28   : > { %v331_v34 = vmul.f32 %v329_v33, %v317_v24  ;;  %v332_v35 = vmul.f32 %v329_v33, %v318_v25  ;;  %v333_v36 = vmul.f32 %v329_v33, %v319_v26  ;;  %v334_v37 = vmul.f32 %v329_v33, %v320_v27 }
  0x29   : > { %v335_v38 = vmul.f32 %v329_v33, %v321_v29  ;;  %v336_v39 = vmul.f32 %v329_v33, %v322_v30  ;;  %v337_v40 = vmul.f32 %v329_v33, %v323_v31  ;;  %v338_v41 = vmul.f32 %v329_v33, %v324_v32 }
  0x2a   : > { %v339_v42 = vmax.f32 %v331_v34, 0.0  ;;  %v340_v43 = vmax.f32 %v332_v35, 0.0  ;;  %v341_v44 = vmax.f32 %v333_v36, 0.0  ;;  %v342_v45 = vmax.f32 %v334_v37, 0.0 }
  0x2b   : > { %v343_v46 = vmax.f32 %v335_v38, 0.0  ;;  %v344_v47 = vmax.f32 %v336_v39, 0.0  ;;  %v345_v48 = vmax.f32 %v337_v40, 0.0  ;;  %v346_v49 = vmax.f32 %v338_v41, 0.0 }
  0x2c   : > { %347 = vst [vmem:[%s284_s29] sm:$0xff] %v339_v42  ;;  %348 = vst [vmem:[%s284_s29 + $0x8] sm:$0xff] %v340_v43 }
  0x2d   : > { %349 = vst [vmem:[%s284_s29 + $0x10] sm:$0xff] %v341_v44  ;;  %350 = vst [vmem:[%s284_s29 + $0x18] sm:$0xff] %v342_v45 }
  0x2e   : > { %351 = vst [vmem:[%s284_s29 + $0x20] sm:$0xff] %v343_v46  ;;  %352 = vst [vmem:[%s284_s29 + $0x28] sm:$0xff] %v344_v47 }
  0x2f   : > { %353 = vst [vmem:[%s284_s29 + $0x30] sm:$0xff] %v345_v48  ;;  %354 = vst [vmem:[%s284_s29 + $0x38] sm:$0xff] %v346_v49 }
  0x30 PF: > { %s13_s14 = sadd.s32 1, %s562_s14   ;;  %s633_s12 = smov %s558_s13 }
  0x31   : > { %p10_p5 = scmp.ge.s32.totalorder %s13_s14, 4   ;;  %s634_s13 = smov %s636_s15 }
  0x33   :  { %12 = sbr.rel (!%p10_p5) target bundleno = 2 (0x2), region = 68 }

// kernel: relu_ins_conv2d_forward.3
= control target key start
LH: loop header
LB: loop body
LE: loop exit
PB: predicated region body
PF: predicated region fallthrough
CT: control target
= control target key end

     0   :  { %s670_s1 = inlined_call_operand.vmem [shape: bf16[128,128], index: 1, kind: input, shape index: {}]   ;;  %s671_s0 = inlined_call_operand.vmem [shape: bf16[128,128], index: 0, kind: input, shape index: {}]   ;;  %s672_s2 = inlined_call_operand.vmem [shape: bf16[128,128], index: 2, kind: output, shape index: {}]  }
   0x1   :  { %v567_v0 = vld [vmem:[%s670_s1] sm:$0xff]   ;;  %v568_v1 = vld [vmem:[%s670_s1 + $0x8] sm:$0xff]   ;;  %v569_v2 = vld [vmem:[%s670_s1 + $0x10] sm:$0xff]  }
   0x2   :  { %519 = vmatprep.subr.bf16.mxu0 %v567_v0  ;;  %551 = vmatprep.subr.bf16.mxu1 %v567_v0  ;;  %v570_v3 = vld [vmem:[%s670_s1 + $0x18] sm:$0xff]   ;;  %v575_v4 = vld [vmem:[%s671_s0] sm:$0xff]   ;;  %v572_v7 = vld [vmem:[%s670_s1 + $0x28] sm:$0xff]  }
   0x3   :  { %520 = vmatpush3.bf16.msra.mxu0 %v567_v0  ;;  %559 = vmatpush3.bf16.msra.mxu1 %v567_v0  ;;  %v576_v5 = vld [vmem:[%s671_s0 + $0x20] sm:$0xff]   ;;  %v573_v8 = vld [vmem:[%s670_s1 + $0x30] sm:$0xff]   ;;  %v574_v9 = vld [vmem:[%s670_s1 + $0x38] sm:$0xff]  }
   0x4   :  { %521 = vmatprep.subr.bf16.mxu0 %v568_v1  ;;  %552 = vmatprep.subr.bf16.mxu1 %v568_v1  ;;  %v571_v6 = vld [vmem:[%s670_s1 + $0x20] sm:$0xff]   ;;  %v577_v10 = vld [vmem:[%s671_s0 + $0x8] sm:$0xff]   ;;  %v579_v12 = vld [vmem:[%s671_s0 + $0x10] sm:$0xff]  }
   0x5   :  { %535 = vmatprep.mubr.bf16.mxu0 %v575_v4  ;;  %543 = vmatprep.mubr.bf16.mxu1 %v576_v5  ;;  %v578_v11 = vld [vmem:[%s671_s0 + $0x28] sm:$0xff]   ;;  %v580_v13 = vld [vmem:[%s671_s0 + $0x30] sm:$0xff]   ;;  %v581_v14 = vld [vmem:[%s671_s0 + $0x18] sm:$0xff]  }
   0x6   :  { %v582_v15 = vld [vmem:[%s671_s0 + $0x38] sm:$0xff]  }
   0x7   :  { %522 = vmatpush3.bf16.msra.mxu0 %v568_v1  ;;  %560 = vmatpush3.bf16.msra.mxu1 %v568_v1 }
   0x8   :  { %523 = vmatprep.subr.bf16.mxu0 %v569_v2  ;;  %553 = vmatprep.subr.bf16.mxu1 %v569_v2 }
   0xb   :  { %524 = vmatpush3.bf16.msra.mxu0 %v569_v2  ;;  %561 = vmatpush3.bf16.msra.mxu1 %v569_v2 }
   0xc   :  { %525 = vmatprep.subr.bf16.mxu0 %v570_v3  ;;  %554 = vmatprep.subr.bf16.mxu1 %v570_v3 }
   0xf   :  { %526 = vmatpush3.bf16.msra.mxu0 %v570_v3  ;;  %562 = vmatpush3.bf16.msra.mxu1 %v570_v3 }
  0x10   :  { %527 = vmatprep.subr.bf16.mxu0 %v571_v6  ;;  %555 = vmatprep.subr.bf16.mxu1 %v571_v6 }
  0x13   :  { %528 = vmatpush3.bf16.msra.mxu0 %v571_v6  ;;  %563 = vmatpush3.bf16.msra.mxu1 %v571_v6 }
  0x14   :  { %529 = vmatprep.subr.bf16.mxu0 %v572_v7  ;;  %556 = vmatprep.subr.bf16.mxu1 %v572_v7 }
  0x17   :  { %530 = vmatpush3.bf16.msra.mxu0 %v572_v7  ;;  %564 = vmatpush3.bf16.msra.mxu1 %v572_v7 }
  0x18   :  { %531 = vmatprep.subr.bf16.mxu0 %v573_v8  ;;  %557 = vmatprep.subr.bf16.mxu1 %v573_v8 }
  0x1b   :  { %532 = vmatpush3.bf16.msra.mxu0 %v573_v8  ;;  %565 = vmatpush3.bf16.msra.mxu1 %v573_v8 }
  0x1c   :  { %533 = vmatprep.subr.bf16.mxu0 %v574_v9  ;;  %558 = vmatprep.subr.bf16.mxu1 %v574_v9 }
  0x1f   :  { %534 = vmatpush3.bf16.msra.mxu0 %v574_v9  ;;  %566 = vmatpush3.bf16.msra.mxu1 %v574_v9 }
  0x22   :  { %536 = vmatmul.mubr.bf16.vlgmr.msra.gmra.mrb[0].mxu0 %v577_v10  ;;  %544 = vmatmul.mubr.bf16.vlgmr.msra.gmra.mrb[0].mxu1 %v578_v11 }
  0x23   :  { %539 = vmatprep.mubr.bf16.mxu0 %v579_v12  ;;  %547 = vmatprep.mubr.bf16.mxu1 %v580_v13 }
  0x2a   :  { %540 = vmatmul.mubr.bf16.gmra.mrb[4].mxu0 %v581_v14  ;;  %548 = vmatmul.mubr.bf16.gmra.mrb[4].mxu1 %v582_v15 }
  0xf5   :  { %v537_v16 = vpop.f32.mrb[0].mxu0  ;;  %v545_v17 = vpop.f32.mrb[0].mxu1 }
  0xf6   :  { %v210_v18 = vpop.f32.mrb[1].mxu0  ;;  %v242_v19 = vpop.f32.mrb[1].mxu1 }
  0xf7   :  { %v538_v20 = vpop.f32.mrb[2].mxu0  ;;  %v546_v21 = vpop.f32.mrb[2].mxu1 }
  0xf8   :  { %v464_v22 = vpack.c.bf16 %v538_v20, %v537_v16  ;;  %v484_v23 = vpack.c.bf16 %v546_v21, %v545_v17  ;;  %v213_v24 = vpop.f32.mrb[3].mxu0  ;;  %v245_v25 = vpop.f32.mrb[3].mxu1 }
  0xf9   :  { %v459_v26 = vpack.c.bf16 %v213_v24, %v210_v18  ;;  %v479_v27 = vpack.c.bf16 %v245_v25, %v242_v19 }
  0xfa   :  { %496 = vst [vmem:[%s672_s2 + $0x8] sm:$0xff] %v464_v22   ;;  %500 = vst [vmem:[%s672_s2 + $0x28] sm:$0xff] %v484_v23  }
  0xfb   :  { %460 = vst [vmem:[%s672_s2] sm:$0xff] %v459_v26   ;;  %499 = vst [vmem:[%s672_s2 + $0x20] sm:$0xff] %v479_v27  }
  0xfd   :  { %v541_v28 = vpop.f32.mrb[4].mxu0  ;;  %v549_v29 = vpop.f32.mrb[4].mxu1 }
  0xfe   :  { %v226_v30 = vpop.f32.mrb[5].mxu0  ;;  %v258_v31 = vpop.f32.mrb[5].mxu1 }
  0xff   :  { %v542_v32 = vpop.f32.mrb[6].mxu0  ;;  %v550_v33 = vpop.f32.mrb[6].mxu1 }
 0x100   :  { %v474_v34 = vpack.c.bf16 %v542_v32, %v541_v28  ;;  %v494_v35 = vpack.c.bf16 %v550_v33, %v549_v29  ;;  %v229_v36 = vpop.f32.mrb[7].mxu0  ;;  %v261_v37 = vpop.f32.mrb[7].mxu1 }
 0x101   :  { %v469_v38 = vpack.c.bf16 %v229_v36, %v226_v30  ;;  %v489_v39 = vpack.c.bf16 %v261_v37, %v258_v31 }
 0x102   :  { %498 = vst [vmem:[%s672_s2 + $0x18] sm:$0xff] %v474_v34   ;;  %502 = vst [vmem:[%s672_s2 + $0x38] sm:$0xff] %v494_v35  }
 0x103   :  { %497 = vst [vmem:[%s672_s2 + $0x10] sm:$0xff] %v469_v38   ;;  %501 = vst [vmem:[%s672_s2 + $0x30] sm:$0xff] %v489_v39  }

</bundles_post_ra>
